<compile_context>
chip_gen: v6e
topology: v6e:2x2x1
jax: 0.10.0
libtpu: 0.0.40
codegen_flags: <defaults>
</compile_context>

<pallas_src>
import functools

import jax
import jax.numpy as jnp
from jax.experimental import pallas as pl
from jax.experimental.pallas import tpu as pltpu

LN_EPS = 1e-5  # torch.nn.LayerNorm default


def ada_layernorm_kernel(x_ref, scale_ref, shift_ref, o_ref, *, d_actual):
    """One (batch, seq-tile) block.

    x_ref     : (1, TILE_T, Dp)  input tile (Dp = D padded to a multiple of 128)
    scale_ref : (1, 1, Dp)       precomputed scale for this batch element
    shift_ref : (1, 1, Dp)       precomputed shift for this batch element
    o_ref     : (1, TILE_T, Dp)  output tile
    d_actual  : true embedding dim (pad lanes hold zeros)
    """
    x = x_ref[0].astype(jnp.float32)                        # (TILE_T, Dp)

    # Single-pass statistics over the last dim.  Pad lanes are zero, so the
    # sums are unaffected; divide by the true D.
    inv_d = 1.0 / d_actual
    s = jnp.sum(x, axis=-1, keepdims=True)
    ss = jnp.sum(x * x, axis=-1, keepdims=True)
    mean = s * inv_d
    var = jnp.maximum(ss * inv_d - mean * mean, 0.0)        # biased var, like torch
    rstd = jax.lax.rsqrt(var + LN_EPS)

    # Modulation terms, computed once per grid step (broadcast over TILE_T).
    gain = 1.0 + scale_ref[0].astype(jnp.float32)           # (1, Dp)
    shift = shift_ref[0].astype(jnp.float32)                # (1, Dp)

    out = (x - mean) * rstd * gain + shift
    o_ref[0] = out.astype(o_ref.dtype)


def _pick_tile_t(T, d_pad, dtype_bytes, budget_bytes=32 * 1024 * 1024):
    """Largest seq-tile (multiple of 8) whose double-buffered in+out blocks fit."""
    max_rows = max(8, budget_bytes // (4 * d_pad * dtype_bytes))
    if T <= max_rows:
        return T
    return max(8, (max_rows // 8) * 8)


def ada_layernorm(x, timestep, w, b):
    """x: (B, T, D), timestep: (B, 1, D), w: (2D, D) torch-layout, b: (2D,)."""
    B, T, D = x.shape
    assert timestep.shape == (B, 1, D)
    assert w.shape == (2 * D, D) and b.shape == (2 * D,)

    # --- hoisted Linear(n_embd, 2*n_embd) + chunk(dim=2): one XLA matmul ---
    emb = jnp.einsum("btd,ed->bte", timestep, w) + b         # (B, 1, 2D)
    scale = emb[..., :D]                                     # (B, 1, D)
    shift = emb[..., D:]                                     # (B, 1, D)

    # --- lane-dense padding: D -> multiple of 128 (no-op for typical D) ---
    d_pad = ((D + 127) // 128) * 128
    if d_pad != D:
        pad = ((0, 0), (0, 0), (0, d_pad - D))
        x_in = jnp.pad(x, pad)
        scale = jnp.pad(scale, pad)
        shift = jnp.pad(shift, pad)
    else:
        x_in = x

    dtype_bytes = jnp.dtype(x.dtype).itemsize
    tile_t = _pick_tile_t(T, d_pad, dtype_bytes)
    grid = (B, pl.cdiv(T, tile_t))

    out = pl.pallas_call(
        functools.partial(ada_layernorm_kernel, d_actual=D),
        out_shape=jax.ShapeDtypeStruct((B, T, d_pad), x.dtype),
        grid_spec=pltpu.PrefetchScalarGridSpec(
            num_scalar_prefetch=0,
            grid=grid,
            in_specs=[
                pl.BlockSpec((1, tile_t, d_pad), lambda bi, ti: (bi, ti, 0)),  # x
                pl.BlockSpec((1, 1, d_pad), lambda bi, ti: (bi, 0, 0)),        # scale
                pl.BlockSpec((1, 1, d_pad), lambda bi, ti: (bi, 0, 0)),        # shift
            ],
            out_specs=pl.BlockSpec((1, tile_t, d_pad), lambda bi, ti: (bi, ti, 0)),
        ),
        compiler_params=pltpu.CompilerParams(
            dimension_semantics=("parallel", "parallel"),
            vmem_limit_bytes=48 * 1024 * 1024,
        ),
        cost_estimate=pl.CostEstimate(
            flops=10 * B * T * D,
            transcendentals=B * T,
            bytes_accessed=2 * B * T * D * dtype_bytes,
        ),
    )(x_in, scale, shift)

    if d_pad != D:
        out = out[..., :D]
    return out


def ada_layernorm_ref(x, timestep, w, b):
    """Pure-JAX reference mirroring the PyTorch forward exactly."""
    emb = jnp.einsum("btd,ed->bte", timestep, w) + b         # Linear(n_embd, 2*n_embd)
    D = x.shape[-1]
    scale, shift = emb[..., :D], emb[..., D:]                # torch.chunk(emb, 2, dim=2)
    mean = jnp.mean(x, axis=-1, keepdims=True)
    var = jnp.mean((x - mean) ** 2, axis=-1, keepdims=True)
    xn = (x - mean) / jnp.sqrt(var + LN_EPS)
    return xn * (1 + scale) + shift


if __name__ == "__main__":
    B, T, D = 2, 8, 32  # batch, seq, n_embd

    key = jax.random.PRNGKey(0)
    kx, kt, kw, kb = jax.random.split(key, 4)

    x = jax.random.normal(kx, (B, T, D), dtype=jnp.float32)
    timestep = jax.random.normal(kt, (B, 1, D), dtype=jnp.float32)

    # Deterministic "Linear(n_embd, 2*n_embd)" parameters (synthetic init).
    bound = 1.0 / (D ** 0.5)
    w = jax.random.uniform(kw, (2 * D, D), minval=-bound, maxval=bound, dtype=jnp.float32)
    b = jax.random.uniform(kb, (2 * D,), minval=-bound, maxval=bound, dtype=jnp.float32)

    out = jax.block_until_ready(ada_layernorm(x, timestep, w, b))
    ref = ada_layernorm_ref(x, timestep, w, b)
    assert jnp.allclose(out, ref, atol=1e-4, rtol=1e-4), "mismatch vs reference"

    print("KERNEL_OK")
</pallas_src>

<mosaic_0001>
module attributes {stable_mosaic.version = 11 : i64} {
  func.func @ada_layernorm_kernel(%arg0: i32, %arg1: i32, %arg2: memref<1x8x128xf32, #tpu.memory_space<vmem>>, %arg3: memref<1x1x128xf32, #tpu.memory_space<vmem>>, %arg4: memref<1x1x128xf32, #tpu.memory_space<vmem>>, %arg5: memref<1x8x128xf32, #tpu.memory_space<vmem>>) attributes {dimension_semantics = [#tpu.dimension_semantics<parallel>, #tpu.dimension_semantics<parallel>], iteration_bounds = array<i64: 2, 1>, scalar_prefetch = 0 : i64, scratch_operands = 0 : i64, tpu.core_type = #tpu.core_type<tc>, window_params = [{transform_indices = @transform_0, window_bounds = array<i64: 1, 8, 128>}, {transform_indices = @transform_1, window_bounds = array<i64: 1, 1, 128>}, {transform_indices = @transform_2, window_bounds = array<i64: 1, 1, 128>}, {transform_indices = @transform_3, window_bounds = array<i64: 1, 8, 128>}]} {
    %c0 = arith.constant 0 : index
    %c0_0 = arith.constant 0 : index
    %c0_1 = arith.constant 0 : index
    %0 = vector.load %arg2[%c0, %c0_0, %c0_1] : memref<1x8x128xf32, #tpu.memory_space<vmem>>, vector<1x8x128xf32>
    %1 = vector.shape_cast %0 : vector<1x8x128xf32> to vector<8x128xf32>
    %cst = arith.constant dense<0.000000e+00> : vector<8xf32>
    %2 = vector.multi_reduction <add>, %1, %cst [1] : vector<8x128xf32> to vector<8xf32>
    %3 = vector.shape_cast %2 : vector<8xf32> to vector<8x1xf32>
    %4 = arith.mulf %1, %1 : vector<8x128xf32>
    %cst_2 = arith.constant dense<0.000000e+00> : vector<8xf32>
    %5 = vector.multi_reduction <add>, %4, %cst_2 [1] : vector<8x128xf32> to vector<8xf32>
    %6 = vector.shape_cast %5 : vector<8xf32> to vector<8x1xf32>
    %cst_3 = arith.constant 3.125000e-02 : f32
    %7 = vector.broadcast %cst_3 : f32 to vector<8x1xf32>
    %8 = arith.mulf %3, %7 : vector<8x1xf32>
    %cst_4 = arith.constant 3.125000e-02 : f32
    %9 = vector.broadcast %cst_4 : f32 to vector<8x1xf32>
    %10 = arith.mulf %6, %9 : vector<8x1xf32>
    %11 = arith.mulf %8, %8 : vector<8x1xf32>
    %12 = arith.subf %10, %11 : vector<8x1xf32>
    %cst_5 = arith.constant 0.000000e+00 : f32
    %13 = vector.broadcast %cst_5 : f32 to vector<8x1xf32>
    %14 = arith.maximumf %12, %13 : vector<8x1xf32>
    %cst_6 = arith.constant 9.99999974E-6 : f32
    %15 = vector.broadcast %cst_6 : f32 to vector<8x1xf32>
    %16 = arith.addf %14, %15 : vector<8x1xf32>
    %17 = math.rsqrt %16 : vector<8x1xf32>
    %c0_7 = arith.constant 0 : index
    %c0_8 = arith.constant 0 : index
    %c0_9 = arith.constant 0 : index
    %18 = vector.load %arg3[%c0_7, %c0_8, %c0_9] : memref<1x1x128xf32, #tpu.memory_space<vmem>>, vector<1x1x128xf32>
    %19 = vector.shape_cast %18 : vector<1x1x128xf32> to vector<1x128xf32>
    %cst_10 = arith.constant 1.000000e+00 : f32
    %20 = vector.broadcast %cst_10 : f32 to vector<1x128xf32>
    %21 = arith.addf %20, %19 : vector<1x128xf32>
    %c0_11 = arith.constant 0 : index
    %c0_12 = arith.constant 0 : index
    %c0_13 = arith.constant 0 : index
    %22 = vector.load %arg4[%c0_11, %c0_12, %c0_13] : memref<1x1x128xf32, #tpu.memory_space<vmem>>, vector<1x1x128xf32>
    %23 = vector.shape_cast %22 : vector<1x1x128xf32> to vector<1x128xf32>
    %24 = vector.broadcast %8 : vector<8x1xf32> to vector<8x128xf32>
    %25 = arith.subf %1, %24 : vector<8x128xf32>
    %26 = vector.broadcast %17 : vector<8x1xf32> to vector<8x128xf32>
    %27 = arith.mulf %25, %26 : vector<8x128xf32>
    %28 = vector.broadcast %21 : vector<1x128xf32> to vector<8x128xf32>
    %29 = arith.mulf %27, %28 : vector<8x128xf32>
    %30 = vector.broadcast %23 : vector<1x128xf32> to vector<8x128xf32>
    %31 = arith.addf %29, %30 : vector<8x128xf32>
    %c0_14 = arith.constant 0 : index
    %c0_15 = arith.constant 0 : index
    %c0_16 = arith.constant 0 : index
    %32 = vector.load %arg5[%c0_14, %c0_15, %c0_16] : memref<1x8x128xf32, #tpu.memory_space<vmem>>, vector<1x8x128xf32>
    %33 = vector.shape_cast %32 : vector<1x8x128xf32> to vector<8x128xf32>
    %34 = vector.shape_cast %31 : vector<8x128xf32> to vector<1x8x128xf32>
    tpu.vector_store %arg5[%c0_14, %c0_15, %c0_16], %34 {strides = array<i32>} : memref<1x8x128xf32, #tpu.memory_space<vmem>>, vector<1x8x128xf32>,
    return
  }
  func.func @transform_0(%arg0: i32, %arg1: i32) -> (i32, i32, i32) {
    %c0_i32 = arith.constant 0 : i32
    %c0_i32_0 = arith.constant 0 : i32
    return %arg0, %arg1, %c0_i32 : i32, i32, i32
  }
  func.func @transform_1(%arg0: i32, %arg1: i32) -> (i32, i32, i32) {
    %c0_i32 = arith.constant 0 : i32
    %c0_i32_0 = arith.constant 0 : i32
    %c0_i32_1 = arith.constant 0 : i32
    return %arg0, %c0_i32, %c0_i32_0 : i32, i32, i32
  }
  func.func @transform_2(%arg0: i32, %arg1: i32) -> (i32, i32, i32) {
    %c0_i32 = arith.constant 0 : i32
    %c0_i32_0 = arith.constant 0 : i32
    %c0_i32_1 = arith.constant 0 : i32
    return %arg0, %c0_i32, %c0_i32_0 : i32, i32, i32
  }
  func.func @transform_3(%arg0: i32, %arg1: i32) -> (i32, i32, i32) {
    %c0_i32 = arith.constant 0 : i32
    %c0_i32_0 = arith.constant 0 : i32
    return %arg0, %arg1, %c0_i32 : i32, i32, i32
  }
}

</mosaic_0001>

<bundles_post_ra>
// kernel: tpu_custom_call.1
= control target key start
LH: loop header
LB: loop body
LE: loop exit
PB: predicated region body
PF: predicated region fallthrough
CT: control target
= control target key end

     0   :  { %8 = vsyncpa [#allocation3], 0  ;;  %s830_s0 = inlined_call_operand.hbm [shape: f32[2,8,128], index: 0, kind: input, shape index: {}]   ;;  %s831_s1 = inlined_call_operand.hbm [shape: f32[2,1,128], index: 1, kind: input, shape index: {}]   ;;  %s832_s2 = inlined_call_operand.vmem [shape: f32[2,1,128], index: 2, kind: input, shape index: {}]   ;;  %s833_s3 = inlined_call_operand.hbm [shape: f32[2,8,128], index: 3, kind: output, shape index: {}]  }
   0x1   :  { %10 = vsyncpa [#allocation3 + $0x1], 0 }
   0x2   :  { %11 = vsyncpa [#allocation6], 0 }
   0x3   :  { %13 = vsyncpa [#allocation6 + $0x1], 0 }
   0x4   :  { %14 = vsyncpa [#allocation4], 0 }
   0x5   :  { %16 = vsyncpa [#allocation4 + $0x1], 0  ;;  %s657_s12 = smov 0   ;;  %s659_s13 = smov 0  }
   0x6   :  { %s661_s14 = smov 0   ;;  %s663_s15 = smov 0  }
   0x7   :  { %s665_s16 = smov 0   ;;  %s667_s17 = smov 0  }
   0x8 LB: > { %s408_s18 = sadd.s32 4294967295, %s632_s17   ;;  %s409_s19 = sadd.s32 4294967294, %s632_s17   ;;  %s632_s17 = sphi %s667_s17, %s22_s17   ;;  %s628_s16 = sphi %s665_s16, %s845_s16   ;;  %s624_s15 = sphi %s663_s15, %s844_s15   ;;  %s620_s14 = sphi %s661_s14, %s843_s14   ;;  %s616_s13 = sphi %s659_s13, %s842_s13   ;;  %s612_s12 = sphi %s657_s12, %s841_s12  }
   0x9   : > { %s34_s20 = sadd.s32 1, %s628_s16  ;;  %s43_s21 = sadd.s32 1, %s620_s14 }
   0xa   : > { %p36_p0 = scmp.ge.s32.totalorder %s34_s20, 2  ;;  %p50_p1 = scmp.ne.s32.totalorder %s620_s14, %s616_s13 }
   0xb   : > { %p51_p2 = scmp.eq.s32.totalorder %s632_s17, 0  ;;  %p56_p3 = scmp.ne.s32.totalorder %s616_s13, %s612_s12 }
   0xc   : > { %s847_s20 = smov (%p36_p0, %s34_s20), 0  ;;  %p57_p5 = scmp.eq.s32.totalorder %s408_s18, 0 }
   0xd   : > { %p698_p4 = por %p51_p2, %p50_p1  ;;  %s38_s23 = ssub.s32 %s628_s16, %s847_s20 }
   0xe   : > { %p134_p6 = scmp.eq.s32.totalorder %s408_s18, 1  ;;  %p41_p7 = scmp.eq.s32.totalorder %s38_s23, 0 }
   0xf   : > { %p704_p8 = por %p57_p5, %p56_p3  ;;  %p140_p10 = scmp.eq.s32.totalorder %s409_s19, 1 }
  0x10   : > { %p708_p9 = por %p134_p6, %p50_p1  ;;  %p440_p13 = scmp.lt.s32.totalorder %s632_s17, 2 }
  0x11   : > { %s713_s26 = scalar_select %p41_p7, %s620_s14, %s43_s21  }
  0x12   : > { %p715_p11 = por %p140_p10, %p56_p3  ;;  %s722_s28 = sand.u32 1, %s620_s14  }
  0x13   : > { %s412_s29 = sshll.u32 %s722_s28, 3  ;;  %s413_s30 = sshll.u32 %s628_s16, 7 }
  0x14   : > { %s170_s6 = scalar_lea.hbm %s830_s0, %s413_s30  ;;  %s164_s7 = scalar_lea.vmem [#allocation2], %s412_s29 }
  0x15   : > { %s172_s8 = sshll.u32 %s164_s7, 4  ;;  %p731_p0 = pnand %p440_p13, %p698_p4  ;;  %s173_s8 = int_to_ptr.vmem [resolvable:$true] %s172_s8 }
  0x16   : > { %p415_p1 = scmp.ge.s32.totalorder %s632_s17, 1  ;;  %p200_p2 = scmp.lt.s32.totalorder %s632_s17, 3 }
  0x17   : > { %s161_s10 = scalar_lea.sflag [#allocation3], %s722_s28  ;;  %p494_p3 = pneg %p731_p0 }
  0x18   : > { %s505_s11 = scalar_lea.vmem %s173_s8, 128  ;;  %s634_s18 = smov [#allocation2]  }
  0x19   : > { %p506_p5 = scmp.ne.s32.totalorder %s173_s8, %s505_s11  ;;  %s510_s19 = sshll.u32 %s634_s18, 4  ;;  %s511_s19 = int_to_ptr.vmem [resolvable:$false] %s510_s19 }
  0x1a   : > { %s512_s21 = scalar_lea.vmem %s511_s19, 256  ;;  %p513_p4 = scmp.lt.s32.totalorder %s173_s8, %s511_s19 }
  0x1b   : > { %p508_p6 = pnand %p506_p5, %p494_p3  ;;  %p514_p10 = scmp.lt.s32.totalorder %s512_s21, %s505_s11 }
  0x1d   : > { %p509_p7 = pneg %p508_p6  ;;  %p515_p13 = por %p514_p10, %p513_p4 }
  0x1f   : > { %p516_p12 = pnand %p515_p13, %p509_p7 }
  0x21   : > { %519 = shalt.err (!%p516_p12)
}
  0x22   : > { %432 = dma.hbm_to_vmem [thread:$0]  (!%p731_p0), %s170_s6, 128, %s173_s8, %s161_s10  }
  0x23   : > { %p749_p5 = pnand %p415_p1, %p200_p2  ;;  %s414_s23 = sshll.u32 %s628_s16, 4 }
  0x24   : > { %s182_s29 = scalar_lea.vmem [#allocation5], %s722_s28  ;;  %s187_s7 = scalar_lea.hbm %s831_s1, %s414_s23 }
  0x25   : > { %s189_s30 = sshll.u32 %s182_s29, 4  ;;  %s180_s11 = scalar_lea.sflag [#allocation6], %s722_s28  ;;  %s190_s30 = int_to_ptr.vmem [resolvable:$true] %s189_s30 }
  0x26   : > { %s533_s18 = scalar_lea.vmem %s190_s30, 16  ;;  %s635_s6 = smov [#allocation5]  }
  0x27   : > { %p534_p12 = scmp.ne.s32.totalorder %s190_s30, %s533_s18  ;;  %s538_s8 = sshll.u32 %s635_s6, 4  ;;  %s539_s8 = int_to_ptr.vmem [resolvable:$false] %s538_s8 }
  0x28   : > { %s540_s10 = scalar_lea.vmem %s539_s8, 32  ;;  %p541_p1 = scmp.lt.s32.totalorder %s190_s30, %s539_s8 }
  0x29   : > { %p536_p6 = pnand %p534_p12, %p494_p3  ;;  %p542_p2 = scmp.lt.s32.totalorder %s540_s10, %s533_s18 }
  0x2b   : > { %p537_p7 = pneg %p536_p6  ;;  %p543_p4 = por %p542_p2, %p541_p1 }
  0x2d   : > { %p544_p10 = pnand %p543_p4, %p537_p7 }
  0x2f   : > { %547 = shalt.err (!%p544_p10)
}
  0x30   : > { %435 = dma.hbm_to_vmem [thread:$0]  (!%p731_p0), %s187_s7, 16, %s190_s30, %s180_s11  }
  0x31   : > { %204 = sbr.rel (%p749_p5) target bundleno = 241 (0xf1), region = 32  ;;  %s767_s28 = sand.u32 (!%p749_p5), 1, %s616_s13  }
  0x32   : > { %s416_s19 = sshll.u32 (!%p749_p5), %s767_s28, 3  ;;  %s207_s21 = scalar_lea.sflag (!%p749_p5), [#allocation3], %s767_s28 }
  0x33   : > { %s210_s23 = scalar_lea.vmem (!%p749_p5), [#allocation2], %s416_s19 }
  0x36   : > { %599 = dma.done.wait (%p704_p8), %s207_s21, 128  }
  0x37   : > { %601 = vsyncadd (%p704_p8), %s207_s21, 4294967168  ;;  %s216_s9 = scalar_lea.sflag [#allocation6], %s767_s28  ;;  %s218_s22 = scalar_lea.vmem [#allocation5], %s767_s28 }
  0x38   : > { %603 = dma.done.wait (%p704_p8), %s216_s9, 16  }
  0x39   : > { %605 = vsyncadd (%p704_p8), %s216_s9, 4294967280  ;;  %v251_v0 = vld [vmem:[%s210_s23] sm:$0xff]  ;;  %v270_v10 = vlaneseq  ;;  %p248_p0 = scmp.lt.s32.totalorder %s624_s15, 1  ;;  %s420_s5 = sshll.u32 %s624_s15, 7 }
  0x3a   : > { %252 = vadd.xlane.f32.xlu0 %v251_v0  ;;  %v254_v1 = vmul.f32 %v251_v0, %v251_v0  ;;  %v264_v12 = vld [vmem:[%s218_s22] sm:$0x1]  ;;  %s247_s7 = scalar_lea.vmem [#allocation7], %s416_s19  ;;  %s297_s8 = scalar_lea.hbm %s833_s3, %s420_s5 }
  0x3b   : > { %v271_v11 = vshrl.u32 %v270_v10, 7  ;;  %s249_s24 = scalar_select %p248_p0, %s624_s15, 1  ;;  %v265_v13 = vadd.f32 1.0, %v264_v12 }
  0x3c   : > { %s299_s11 = sshll.u32 %s247_s7, 4  ;;  %s285_s10 = scalar_lea.sflag [#allocation4], %s767_s28  ;;  %s300_s11 = int_to_ptr.vmem [resolvable:$true] %s299_s11 }
  0x3d   : > { %v272_v14 = vsub.s32 0, %v271_v11  ;;  %s250_s4 = scalar_lea.vmem %s832_s2, %s249_s24  ;;  %s548_s21 = scalar_lea.vmem %s300_s11, 128 }
  0x3e   : > { %255 = vadd.xlane.f32.xlu0 %v254_v1  ;;  %v418_v19 = vld [vmem:[%s250_s4] ss:$0 sm:$0xff]  ;;  %p549_p8 = scmp.ne.s32.totalorder %s300_s11, %s548_s21  ;;  %s636_s23 = smov [#allocation7]  }
  0x3f   : > { %v273_v16 = vrot.slane %v265_v13, %v272_v14  ;;  %s552_s9 = sshll.u32 %s636_s23, 4  ;;  %s553_s9 = int_to_ptr.vmem [resolvable:$false] %s552_s9 }
  0x40   : > { %p550_p3 = pnand %p549_p8, %p708_p9  ;;  %s554_s15 = scalar_lea.vmem %s553_s9, 256 }
  0x41   : > { %p555_p5 = scmp.lt.s32.totalorder %s300_s11, %s553_s9  ;;  %p556_p12 = scmp.lt.s32.totalorder %s554_s15, %s548_s21 }
  0x42   : > { %p551_p13 = pneg %p550_p3 }
  0x43   : > { %p557_p6 = por %p556_p12, %p555_p5 }
  0x45   : > { %p558_p7 = pnand %p557_p6, %p551_p13 }
  0xc3   : > { %v253_v2 = vpop.xlane.xlu0 %252 }
  0xc4   : > { %v257_v3 = vmul.f32 0.03125, %v253_v2 }
  0xc6   : > { %v259_v5 = vmul.f32 %v257_v3, %v257_v3  ;;  %v267_v15 = vsub.f32 %v251_v0, %v257_v3 }
  0xc7   : > { %v256_v4 = vpop.xlane.xlu0 %255 }
  0xc8   : > { %v258_v6 = vmul.f32 0.03125, %v256_v4 }
  0xca   : > { %v260_v7 = vsub.f32 %v258_v6, %v259_v5 }
  0xcc   : > { %v261_v8 = vmax.f32 %v260_v7, 0.0 }
  0xce   : > { %v262_v9 = vadd.f32 1e-05, %v261_v8 }
  0xd0   : > { %490 = vrsqrt.f32 %v262_v9 }
  0xdd   : > { %v491_v17 = vpop.eup %490 }
  0xde   : > { %v268_v18 = vmul.f32 %v491_v17, %v267_v15 }
  0xe0   : > { %v275_v20 = vmul.f32 %v273_v16, %v268_v18 }
  0xe2   : > { %v282_v21 = vadd.f32 %v418_v19, %v275_v20 }
  0xe4   : > { %283 = vst [vmem:[%s247_s7] sm:$0xff] %v282_v21 }
  0xe5   : > { %561 = shalt.err (!%p558_p7)
}
  0xe6   : > { %s562_s19 = scalar_lea.hbm %s297_s8, 128  ;;  %s566_s24 = scalar_lea.hbm %s833_s3, 256 }
  0xe7   : > { %p563_p1 = scmp.ne.s32.totalorder %s297_s8, %s562_s19  ;;  %p567_p10 = scmp.lt.s32.totalorder %s297_s8, %s833_s3 }
  0xe8   : > { %p568_p0 = scmp.lt.s32.totalorder %s566_s24, %s562_s19 }
  0xe9   : > { %p564_p2 = pnand %p563_p1, %p708_p9 }
  0xea   : > { %p569_p8 = por %p568_p0, %p567_p10 }
  0xeb   : > { %p565_p4 = pneg %p564_p2 }
  0xed   : > { %p570_p3 = pnand %p569_p8, %p565_p4 }
  0xef   : > { %573 = shalt.err (!%p570_p3)
}
  0xf0   : > { %427 = dma.vmem_to_hbm [thread:$0]  (%p708_p9), %s300_s11, 128, %s297_s8, %s285_s10  }
  0xf1 PF: > { %s311_s4 = sand.u32 1, %s612_s12   ;;  %p840_p13 = scmp.ge.s32.totalorder %s632_s17, 2 }
  0xf2   : > { %s312_s5 = scalar_lea.sflag [#allocation4], %s311_s4 }
  0xf3   : > { %p437_p5 = pnand %p840_p13, %p715_p11 }
  0xf5   : > { %p438_p12 = pneg %p437_p5 }
  0xf7   : > { %607 = dma.done.wait (%p438_p12), %s312_s5, 128  }
  0xf8   : > { %609 = vsyncadd (%p438_p12), %s312_s5, 4294967168  ;;  %s22_s17 = sadd.s32 1, %s632_s17   ;;  %s841_s12 = smov %s616_s13 }
  0xf9   : > { %p19_p6 = scmp.ge.s32.totalorder %s22_s17, 4   ;;  %s842_s13 = smov %s620_s14 }
  0xfa   : > { %s843_s14 = smov %s713_s26  ;;  %s844_s15 = smov %s628_s16 }
  0xfb   : > { %s845_s16 = smov %s847_s20  ;;  %21 = sbr.rel (!%p19_p6) target bundleno = 8 (0x8), region = 93 }
 0x100   :  { %317 = vsyncpa [#allocation3], 1 }
 0x101   :  { %319 = vsyncpa [#allocation3 + $0x1], 1 }
 0x102   :  { %320 = vsyncpa [#allocation6], 1 }
 0x103   :  { %322 = vsyncpa [#allocation6 + $0x1], 1 }
 0x104   :  { %323 = vsyncpa [#allocation4], 1 }
 0x105   :  { %325 = vsyncpa [#allocation4 + $0x1], 1 }

</bundles_post_ra>
